<compile_context>
chip_gen: v7x
topology: tpu7x:2x2x1
jax: 0.10.0
libtpu: 0.0.40
codegen_flags: <defaults>
</compile_context>

<pallas_src>
import functools

import jax
import jax.numpy as jnp
from jax import lax
from jax.experimental import pallas as pl
from jax.experimental.pallas import tpu as pltpu

_EPS = 1e-5
_NEG_SLOPE = 0.01                 # nn.LeakyReLU default
_VMEM_LIMIT = 32 * 1024 * 1024


def _round_up(x, m):
    return (x + m - 1) // m * m


# ---------------------------------------------------------------------------
# Kernels
# ---------------------------------------------------------------------------
def _valid_col_mask(L, Wp, W):
    """(1, L) f32 mask of valid flattened columns, built in-kernel (free VPU ops)."""
    col = lax.broadcasted_iota(jnp.int32, (1, L), 1) % Wp
    return (col < W).astype(jnp.float32)


def _conv1_stats_kernel(x_ref, w_ref, y_ref, sum_ref, ssq_ref, *, W, Wp, C, L):
    """conv1 as 3 dx-grouped MXU matmuls (K = 3*Cin) + per-image BN1 partial stats.

    x_ref : (1, 3*Cin, L+2) bf16  dy-stacked, padded, row-flattened image
    w_ref : (3, C, 3*Cin)   bf16  per-dx weights, columns ordered dy*Cin + c
    y_ref : (1, C, L)       bf16  raw conv1 output (cols >= W of each row: junk)
    """
    acc = jnp.zeros((C, L), jnp.float32)
    for dx in range(3):
        acc = acc + jnp.dot(w_ref[dx], x_ref[0, :, dx:dx + L],
                            preferred_element_type=jnp.float32)
    y_ref[0] = acc.astype(y_ref.dtype)             # lane-dense store (L % 128 == 0)

    mask = _valid_col_mask(L, Wp, W)
    accv = acc * mask
    sum_ref[0] = jnp.sum(accv, axis=1, keepdims=True)           # (C, 1)
    ssq_ref[0] = jnp.sum(accv * accv, axis=1, keepdims=True)    # (C, 1)


def _bn_act_conv2_stats_kernel(y1_ref, scale_ref, shift_ref, w_ref,
                               y2_ref, sum_ref, ssq_ref, xp_ref, *, W, Wp, C, L):
    """BN1-normalize + LeakyReLU, re-pad in VMEM, conv2 (9 shifted-slice matmuls)
    + per-image BN2 partial stats."""
    mask = _valid_col_mask(L, Wp, W)

    a = y1_ref[0].astype(jnp.float32) * scale_ref[...] + shift_ref[...]
    a = jnp.where(a >= 0.0, a, _NEG_SLOPE * a)      # LeakyReLU (f32)
    a = a * mask                                    # zero junk columns
    # TODO(synk): training-mode Dropout(p > 0) would mask `a` here with pltpu PRNG bits.

    # Re-pad conv2's input inside VMEM.  Only the small never-overwritten border
    # regions are re-zeroed each step (no full-scratch memset), which also keeps
    # the grid axis safely 'parallel' (no cross-step scratch state).
    flat = xp_ref.shape[1]
    xp_ref[:, :Wp + 1] = jnp.zeros((C, Wp + 1), xp_ref.dtype)
    xp_ref[:, Wp + 1 + L:] = jnp.zeros((C, flat - (Wp + 1 + L)), xp_ref.dtype)
    xp_ref[:, Wp + 1:Wp + 1 + L] = a.astype(xp_ref.dtype)       # bf16 cast hoisted

    acc = jnp.zeros((C, L), jnp.float32)
    for k in range(9):
        dy, dx = divmod(k, 3)
        off = dy * Wp + dx
        acc = acc + jnp.dot(w_ref[k], xp_ref[:, off:off + L],
                            preferred_element_type=jnp.float32)
    y2_ref[0] = acc.astype(y2_ref.dtype)

    accv = acc * mask
    sum_ref[0] = jnp.sum(accv, axis=1, keepdims=True)
    ssq_ref[0] = jnp.sum(accv * accv, axis=1, keepdims=True)


# ---------------------------------------------------------------------------
# pallas_call wrappers
# ---------------------------------------------------------------------------
def conv1_stats(x3, w1t, *, N, W, Wp, C, L, Cin):
    kernel = functools.partial(_conv1_stats_kernel, W=W, Wp=Wp, C=C, L=L)
    flops = 2 * 9 * N * L * Cin * C
    bytes_acc = int(x3.size * 2 + w1t.size * 2 + N * C * L * 2 + 2 * N * C * 4)
    return pl.pallas_call(
        kernel,
        grid=(N,),
        in_specs=[
            pl.BlockSpec((1, 3 * Cin, L + 2), lambda n: (n, 0, 0)),
            pl.BlockSpec((3, C, 3 * Cin), lambda n: (0, 0, 0)),
        ],
        out_specs=[
            pl.BlockSpec((1, C, L), lambda n: (n, 0, 0)),
            pl.BlockSpec((1, C, 1), lambda n: (n, 0, 0)),
            pl.BlockSpec((1, C, 1), lambda n: (n, 0, 0)),
        ],
        out_shape=[
            jax.ShapeDtypeStruct((N, C, L), jnp.bfloat16),
            jax.ShapeDtypeStruct((N, C, 1), jnp.float32),
            jax.ShapeDtypeStruct((N, C, 1), jnp.float32),
        ],
        compiler_params=pltpu.CompilerParams(
            dimension_semantics=("parallel",),         # per-image partial stats
            vmem_limit_bytes=_VMEM_LIMIT,
        ),
        cost_estimate=pl.CostEstimate(flops=flops, transcendentals=0,
                                      bytes_accessed=bytes_acc),
    )(x3, w1t)


def bn_act_conv2_stats(y1, scale1, shift1, w2t, *, N, W, Wp, C, L, flat):
    kernel = functools.partial(_bn_act_conv2_stats_kernel, W=W, Wp=Wp, C=C, L=L)
    flops = 2 * 9 * N * L * C * C
    bytes_acc = int(y1.size * 2 + 2 * C * 4 + w2t.size * 2
                    + N * C * L * 2 + 2 * N * C * 4)
    return pl.pallas_call(
        kernel,
        grid=(N,),
        in_specs=[
            pl.BlockSpec((1, C, L), lambda n: (n, 0, 0)),
            pl.BlockSpec((C, 1), lambda n: (0, 0)),
            pl.BlockSpec((C, 1), lambda n: (0, 0)),
            pl.BlockSpec((9, C, C), lambda n: (0, 0, 0)),
        ],
        out_specs=[
            pl.BlockSpec((1, C, L), lambda n: (n, 0, 0)),
            pl.BlockSpec((1, C, 1), lambda n: (n, 0, 0)),
            pl.BlockSpec((1, C, 1), lambda n: (n, 0, 0)),
        ],
        out_shape=[
            jax.ShapeDtypeStruct((N, C, L), jnp.bfloat16),
            jax.ShapeDtypeStruct((N, C, 1), jnp.float32),
            jax.ShapeDtypeStruct((N, C, 1), jnp.float32),
        ],
        scratch_shapes=[pltpu.VMEM((C, flat), jnp.bfloat16)],
        compiler_params=pltpu.CompilerParams(
            dimension_semantics=("parallel",),
            vmem_limit_bytes=_VMEM_LIMIT,
        ),
        cost_estimate=pl.CostEstimate(flops=flops, transcendentals=0,
                                      bytes_accessed=bytes_acc),
    )(y1, scale1, shift1, w2t)


# ---------------------------------------------------------------------------
# Plain-JAX glue (layout, BN finalize, fused XLA epilogue)
# ---------------------------------------------------------------------------
def _bn_scale_shift(psum, pssq, gamma, beta, count):
    s = jnp.sum(psum, axis=0)                # (C, 1) reduce per-image partials
    ss = jnp.sum(pssq, axis=0)
    mean = s / count
    var = ss / count - mean * mean           # biased variance (training-mode BN)
    inv = lax.rsqrt(var + _EPS)
    scale = gamma.reshape(-1, 1) * inv
    shift = beta.reshape(-1, 1) - mean * scale
    return scale.astype(jnp.float32), shift.astype(jnp.float32)


def _w1_dx_grouped(w):
    # (C, Cin, 3, 3)[o, c, dy, dx] -> (3, C, 3*Cin)[dx, o, dy*Cin + c]  (bf16)
    C, Cin = w.shape[0], w.shape[1]
    return jnp.transpose(w, (3, 0, 2, 1)).reshape(3, C, 3 * Cin).astype(jnp.bfloat16)


def _w2_taps(w):
    # (C, C, 3, 3)[o, c, dy, dx] -> (9, C, C)[dy*3 + dx, o, c]  (bf16)
    C = w.shape[0]
    return jnp.transpose(w, (2, 3, 0, 1)).reshape(9, C, C).astype(jnp.bfloat16)


def convblock_forward(params, x_nchw, dropout_p=0.0):
    if dropout_p != 0.0:
        # TODO(synk): training-mode Dropout(p > 0) not implemented (stochastic).
        raise NotImplementedError("dropout_p > 0 is not implemented")

    N, Cin, H, W = x_nchw.shape
    C = params["w1"].shape[0]
    Wp = _round_up(W + 2, 8)      # padded row width, multiple of 8
    Hp = H + 3                    # 1 top + 2 bottom pad rows
    L = H * Wp                    # flattened conv-output length per image
    flat = Hp * Wp

    # Pad, keep channels-first (matches NCHW, no transpose needed), flatten rows
    # with stride Wp, then stack 3 dy-shifted copies along channels so conv1
    # contracts all three dy taps in one MXU push per dx.  One bf16 cast here.
    xpad = jnp.pad(x_nchw.astype(jnp.float32),
                   ((0, 0), (0, 0), (1, 2), (1, Wp - W - 1)))
    xflat = xpad.reshape(N, Cin, flat)
    x3 = jnp.concatenate(
        [xflat[:, :, dy * Wp: dy * Wp + L + 2] for dy in range(3)],
        axis=1).astype(jnp.bfloat16)                          # (N, 3*Cin, L+2)

    w1t = _w1_dx_grouped(params["w1"])
    w2t = _w2_taps(params["w2"])
    # Conv biases b1/b2 intentionally NOT passed: training-mode BatchNorm mean
    # subtraction cancels them exactly.

    count = jnp.float32(N * H * W)

    # Pass 1 (Pallas): conv1 + per-image BN1 partial stats.
    y1, s1, ss1 = conv1_stats(x3, w1t, N=N, W=W, Wp=Wp, C=C, L=L, Cin=Cin)
    scale1, shift1 = _bn_scale_shift(s1, ss1, params["g1"], params["be1"], count)

    # Pass 2 (Pallas): BN1 + LeakyReLU + conv2 + per-image BN2 partial stats.
    y2, s2, ss2 = bn_act_conv2_stats(y1, scale1, shift1, w2t,
                                     N=N, W=W, Wp=Wp, C=C, L=L, flat=flat)
    scale2, shift2 = _bn_scale_shift(s2, ss2, params["g2"], params["be2"], count)

    # Pass 3 (XLA, fused with the un-pad slice): BN2 + LeakyReLU, drop junk cols.
    a2 = y2.astype(jnp.float32) * scale2[None] + shift2[None]
    a2 = jnp.where(a2 >= 0.0, a2, _NEG_SLOPE * a2)
    out = a2.reshape(N, C, H, Wp)[:, :, :, :W]                # NCHW output
    return out
    # TODO(synk): for large H/W add a row-block grid axis (1-row halo) so the
    # per-step VMEM working set stays bounded on 64 MiB-VMEM chips (v7x).


# ---------------------------------------------------------------------------
# Pure-JAX reference (f32) and demo
# ---------------------------------------------------------------------------
def _reference(params, x):
    def conv(z, w, b):
        y = lax.conv_general_dilated(z, w, (1, 1), ((1, 1), (1, 1)),
                                     dimension_numbers=("NCHW", "OIHW", "NCHW"))
        return y + b.reshape(1, -1, 1, 1)

    def bn_lrelu(y, g, b):
        mean = jnp.mean(y, axis=(0, 2, 3), keepdims=True)
        var = jnp.mean((y - mean) ** 2, axis=(0, 2, 3), keepdims=True)
        yn = (y - mean) * lax.rsqrt(var + _EPS)
        yn = yn * g.reshape(1, -1, 1, 1) + b.reshape(1, -1, 1, 1)
        return jnp.where(yn >= 0.0, yn, _NEG_SLOPE * yn)

    y = bn_lrelu(conv(x, params["w1"], params["b1"]), params["g1"], params["be1"])
    y = bn_lrelu(conv(y, params["w2"], params["b2"]), params["g2"], params["be2"])
    return y


def init_params(key, in_channels, out_channels):
    ks = jax.random.split(key, 4)
    s = 0.1
    return {
        "w1": s * jax.random.normal(ks[0], (out_channels, in_channels, 3, 3), jnp.float32),
        "b1": s * jax.random.normal(ks[1], (out_channels,), jnp.float32),  # cancelled by BN1
        "g1": jnp.ones((out_channels,), jnp.float32),
        "be1": jnp.zeros((out_channels,), jnp.float32),
        "w2": s * jax.random.normal(ks[2], (out_channels, out_channels, 3, 3), jnp.float32),
        "b2": s * jax.random.normal(ks[3], (out_channels,), jnp.float32),  # cancelled by BN2
        "g2": jnp.ones((out_channels,), jnp.float32),
        "be2": jnp.zeros((out_channels,), jnp.float32),
    }


if __name__ == "__main__":
    N, Cin, H, W = 2, 4, 16, 16
    Cout = 8

    key = jax.random.PRNGKey(0)
    kp, kx = jax.random.split(key)
    params = init_params(kp, Cin, Cout)
    x = jax.random.normal(kx, (N, Cin, H, W), jnp.float32)    # NCHW

    out = jax.block_until_ready(convblock_forward(params, x, dropout_p=0.0))

    assert out.shape == (N, Cout, H, W), out.shape
    assert bool(jnp.all(jnp.isfinite(out)))

    ref = _reference(params, x)
    max_err = float(jnp.max(jnp.abs(out - ref)))
    assert max_err < 0.15, f"max abs err vs f32 reference: {max_err}"

    print("KERNEL_OK")
</pallas_src>

<mosaic_0001>
module attributes {stable_mosaic.version = 11 : i64} {
  func.func @_conv1_stats_kernel(%arg0: i32, %arg1: memref<1x12x386xbf16, #tpu.memory_space<vmem>>, %arg2: memref<3x8x12xbf16, #tpu.memory_space<vmem>>, %arg3: memref<1x8x384xbf16, #tpu.memory_space<vmem>>, %arg4: memref<1x8x1xf32, #tpu.memory_space<vmem>>, %arg5: memref<1x8x1xf32, #tpu.memory_space<vmem>>) attributes {dimension_semantics = [#tpu.dimension_semantics<parallel>], iteration_bounds = array<i64: 2>, scalar_prefetch = 0 : i64, scratch_operands = 0 : i64, tpu.core_type = #tpu.core_type<tc>, window_params = [{transform_indices = @transform_0, window_bounds = array<i64: 1, 12, 386>}, {pipeline_mode = #tpu.pipeline_mode<synchronous>, transform_indices = @transform_1, window_bounds = array<i64: 3, 8, 12>}, {transform_indices = @transform_2, window_bounds = array<i64: 1, 8, 384>}, {transform_indices = @transform_3, window_bounds = array<i64: 1, 8, 1>}, {transform_indices = @transform_4, window_bounds = array<i64: 1, 8, 1>}]} {
    %cst = arith.constant 0.000000e+00 : f32
    %0 = vector.broadcast %cst : f32 to vector<8x384xf32>
    %c0 = arith.constant 0 : index
    %c0_0 = arith.constant 0 : index
    %c0_1 = arith.constant 0 : index
    %1 = vector.load %arg2[%c0, %c0_0, %c0_1] : memref<3x8x12xbf16, #tpu.memory_space<vmem>>, vector<1x8x12xbf16>
    %2 = vector.shape_cast %1 : vector<1x8x12xbf16> to vector<8x12xbf16>
    %c0_2 = arith.constant 0 : index
    %c0_3 = arith.constant 0 : index
    %c0_4 = arith.constant 0 : index
    %3 = vector.load %arg1[%c0_2, %c0_3, %c0_4] : memref<1x12x386xbf16, #tpu.memory_space<vmem>>, vector<1x12x384xbf16>
    %4 = vector.shape_cast %3 : vector<1x12x384xbf16> to vector<12x384xbf16>
    %cst_5 = arith.constant dense<0.000000e+00> : vector<8x384xf32>
    %5 = tpu.matmul %2, %4, %cst_5 {dimension_numbers = #tpu.dot_dimension_numbers<[1], [0], [0], [1], [0, 0, 1, 1], [], []>} : vector<8x12xbf16>, vector<12x384xbf16>, vector<8x384xf32> -> vector<8x384xf32>
    %6 = arith.addf %0, %5 : vector<8x384xf32>
    %c1 = arith.constant 1 : index
    %c0_6 = arith.constant 0 : index
    %c0_7 = arith.constant 0 : index
    %7 = vector.load %arg2[%c1, %c0_6, %c0_7] : memref<3x8x12xbf16, #tpu.memory_space<vmem>>, vector<1x8x12xbf16>
    %8 = vector.shape_cast %7 : vector<1x8x12xbf16> to vector<8x12xbf16>
    %c0_8 = arith.constant 0 : index
    %c0_9 = arith.constant 0 : index
    %c1_10 = arith.constant 1 : index
    %9 = vector.load %arg1[%c0_8, %c0_9, %c1_10] : memref<1x12x386xbf16, #tpu.memory_space<vmem>>, vector<1x12x384xbf16>
    %10 = vector.shape_cast %9 : vector<1x12x384xbf16> to vector<12x384xbf16>
    %cst_11 = arith.constant dense<0.000000e+00> : vector<8x384xf32>
    %11 = tpu.matmul %8, %10, %cst_11 {dimension_numbers = #tpu.dot_dimension_numbers<[1], [0], [0], [1], [0, 0, 1, 1], [], []>} : vector<8x12xbf16>, vector<12x384xbf16>, vector<8x384xf32> -> vector<8x384xf32>
    %12 = arith.addf %6, %11 : vector<8x384xf32>
    %c2 = arith.constant 2 : index
    %c0_12 = arith.constant 0 : index
    %c0_13 = arith.constant 0 : index
    %13 = vector.load %arg2[%c2, %c0_12, %c0_13] : memref<3x8x12xbf16, #tpu.memory_space<vmem>>, vector<1x8x12xbf16>
    %14 = vector.shape_cast %13 : vector<1x8x12xbf16> to vector<8x12xbf16>
    %c0_14 = arith.constant 0 : index
    %c0_15 = arith.constant 0 : index
    %c2_16 = arith.constant 2 : index
    %15 = vector.load %arg1[%c0_14, %c0_15, %c2_16] : memref<1x12x386xbf16, #tpu.memory_space<vmem>>, vector<1x12x384xbf16>
    %16 = vector.shape_cast %15 : vector<1x12x384xbf16> to vector<12x384xbf16>
    %cst_17 = arith.constant dense<0.000000e+00> : vector<8x384xf32>
    %17 = tpu.matmul %14, %16, %cst_17 {dimension_numbers = #tpu.dot_dimension_numbers<[1], [0], [0], [1], [0, 0, 1, 1], [], []>} : vector<8x12xbf16>, vector<12x384xbf16>, vector<8x384xf32> -> vector<8x384xf32>
    %18 = arith.addf %12, %17 : vector<8x384xf32>
    %19 = arith.truncf %18 : vector<8x384xf32> to vector<8x384xbf16>
    %c0_18 = arith.constant 0 : index
    %c0_19 = arith.constant 0 : index
    %c0_20 = arith.constant 0 : index
    %20 = vector.load %arg3[%c0_18, %c0_19, %c0_20] : memref<1x8x384xbf16, #tpu.memory_space<vmem>>, vector<1x8x384xbf16>
    %21 = vector.shape_cast %20 : vector<1x8x384xbf16> to vector<8x384xbf16>
    %22 = vector.shape_cast %19 : vector<8x384xbf16> to vector<1x8x384xbf16>
    tpu.vector_store %arg3[%c0_18, %c0_19, %c0_20], %22 {strides = array<i32>} : memref<1x8x384xbf16, #tpu.memory_space<vmem>>, vector<1x8x384xbf16>,
    %23 = tpu.iota {dimensions = array<i32: 1>} : vector<1x384xi32>
    %c24_i32 = arith.constant 24 : i32
    %c0_i32 = arith.constant 0 : i32
    %24 = arith.cmpi eq, %c24_i32, %c0_i32 : i32
    %c1_i32 = arith.constant 1 : i32
    %25 = arith.select %24, %c1_i32, %c24_i32 : i32
    %26 = vector.broadcast %25 : i32 to vector<1x384xi32>
    %27 = arith.remsi %23, %26 : vector<1x384xi32>
    %c0_i32_21 = arith.constant 0 : i32
    %28 = vector.broadcast %c0_i32_21 : i32 to vector<1x384xi32>
    %29 = arith.cmpi ne, %27, %28 : vector<1x384xi32>
    %c0_i32_22 = arith.constant 0 : i32
    %30 = vector.broadcast %c0_i32_22 : i32 to vector<1x384xi32>
    %31 = arith.cmpi slt, %27, %30 : vector<1x384xi32>
    %c0_i32_23 = arith.constant 0 : i32
    %32 = arith.cmpi slt, %25, %c0_i32_23 : i32
    %33 = vector.broadcast %32 : i1 to vector<1x384xi1>
    %34 = vector.broadcast %33 : vector<1x384xi1> to vector<1x384xi1>
    %35 = arith.xori %31, %34 : vector<1x384xi1>
    %36 = arith.andi %35, %29 : vector<1x384xi1>
    %37 = vector.broadcast %25 : i32 to vector<1x384xi32>
    %38 = arith.addi %27, %37 : vector<1x384xi32>
    %39 = arith.select %36, %38, %27 : vector<1x384xi1>, vector<1x384xi32>
    %c16_i32 = arith.constant 16 : i32
    %40 = vector.broadcast %c16_i32 : i32 to vector<1x384xi32>
    %41 = arith.cmpi slt, %39, %40 : vector<1x384xi32>
    %42 = arith.extui %41 : vector<1x384xi1> to vector<1x384xi32>
    %43 = arith.sitofp %42 : vector<1x384xi32> to vector<1x384xf32>
    %44 = vector.broadcast %43 : vector<1x384xf32> to vector<8x384xf32>
    %45 = arith.mulf %18, %44 : vector<8x384xf32>
    %cst_24 = arith.constant dense<0.000000e+00> : vector<8xf32>
    %46 = vector.multi_reduction <add>, %45, %cst_24 [1] : vector<8x384xf32> to vector<8xf32>
    %47 = vector.shape_cast %46 : vector<8xf32> to vector<8x1xf32>
    %c0_25 = arith.constant 0 : index
    %c0_26 = arith.constant 0 : index
    %c0_27 = arith.constant 0 : index
    %48 = vector.load %arg4[%c0_25, %c0_26, %c0_27] : memref<1x8x1xf32, #tpu.memory_space<vmem>>, vector<1x8x1xf32>
    %49 = vector.shape_cast %48 : vector<1x8x1xf32> to vector<8x1xf32>
    %50 = vector.shape_cast %47 : vector<8x1xf32> to vector<1x8x1xf32>
    tpu.vector_store %arg4[%c0_25, %c0_26, %c0_27], %50 {strides = array<i32>} : memref<1x8x1xf32, #tpu.memory_space<vmem>>, vector<1x8x1xf32>,
    %51 = arith.mulf %45, %45 : vector<8x384xf32>
    %cst_28 = arith.constant dense<0.000000e+00> : vector<8xf32>
    %52 = vector.multi_reduction <add>, %51, %cst_28 [1] : vector<8x384xf32> to vector<8xf32>
    %53 = vector.shape_cast %52 : vector<8xf32> to vector<8x1xf32>
    %c0_29 = arith.constant 0 : index
    %c0_30 = arith.constant 0 : index
    %c0_31 = arith.constant 0 : index
    %54 = vector.load %arg5[%c0_29, %c0_30, %c0_31] : memref<1x8x1xf32, #tpu.memory_space<vmem>>, vector<1x8x1xf32>
    %55 = vector.shape_cast %54 : vector<1x8x1xf32> to vector<8x1xf32>
    %56 = vector.shape_cast %53 : vector<8x1xf32> to vector<1x8x1xf32>
    tpu.vector_store %arg5[%c0_29, %c0_30, %c0_31], %56 {strides = array<i32>} : memref<1x8x1xf32, #tpu.memory_space<vmem>>, vector<1x8x1xf32>,
    return
  }
  func.func @transform_0(%arg0: i32) -> (i32, i32, i32) {
    %c0_i32 = arith.constant 0 : i32
    %c0_i32_0 = arith.constant 0 : i32
    %c0_i32_1 = arith.constant 0 : i32
    return %arg0, %c0_i32, %c0_i32_0 : i32, i32, i32
  }
  func.func @transform_1(%arg0: i32) -> (i32, i32, i32) {
    %c0_i32 = arith.constant 0 : i32
    %c0_i32_0 = arith.constant 0 : i32
    %c0_i32_1 = arith.constant 0 : i32
    %c0_i32_2 = arith.constant 0 : i32
    return %c0_i32, %c0_i32_0, %c0_i32_1 : i32, i32, i32
  }
  func.func @transform_2(%arg0: i32) -> (i32, i32, i32) {
    %c0_i32 = arith.constant 0 : i32
    %c0_i32_0 = arith.constant 0 : i32
    %c0_i32_1 = arith.constant 0 : i32
    return %arg0, %c0_i32, %c0_i32_0 : i32, i32, i32
  }
  func.func @transform_3(%arg0: i32) -> (i32, i32, i32) {
    %c0_i32 = arith.constant 0 : i32
    %c0_i32_0 = arith.constant 0 : i32
    %c0_i32_1 = arith.constant 0 : i32
    return %arg0, %c0_i32, %c0_i32_0 : i32, i32, i32
  }
  func.func @transform_4(%arg0: i32) -> (i32, i32, i32) {
    %c0_i32 = arith.constant 0 : i32
    %c0_i32_0 = arith.constant 0 : i32
    %c0_i32_1 = arith.constant 0 : i32
    return %arg0, %c0_i32, %c0_i32_0 : i32, i32, i32
  }
}

</mosaic_0001>

<bundles_post_ra>
// kernel: tpu_custom_call.1
= control target key start
LH: loop header
LB: loop body
LE: loop exit
PB: predicated region body
PF: predicated region fallthrough
CT: control target
= control target key end

     0   :  { %10 = vsyncpa [#allocation3], 0  ;;  %s1175_s0 = inlined_call_operand.vmem [shape: bf16[2,12,386], index: 0, kind: input, shape index: {}]   ;;  %s1176_s1 = inlined_call_operand.vmem [shape: bf16[3,8,12], index: 1, kind: input, shape index: {}]   ;;  %s1177_s2 = inlined_call_operand.hbm [shape: bf16[2,8,384], index: 2, kind: output, shape index: {0}]   ;;  %s1178_s3 = inlined_call_operand.vmem [shape: f32[2,8,1], index: 3, kind: output, shape index: {1}]   ;;  %s1179_s4 = inlined_call_operand.vmem [shape: f32[2,8,1], index: 4, kind: output, shape index: {2}]  }
   0x1   :  { %12 = vsyncpa [#allocation3 + $0x1], 0  ;;  %s1016_s15 = smov 0   ;;  %s1018_s16 = smov 0  }
   0x2   :  { %s1020_s17 = smov 0   ;;  %s1022_s18 = smov 0  }
   0x3 LB: > { %s1037_s19 = sadd.s32 4294967295, %s983_s18   ;;  %s787_s20 = sadd.s32 4294967294, %s983_s18   ;;  %s983_s18 = sphi %s1022_s18, %s1185_s18   ;;  %s979_s17 = sphi %s1020_s17, %s1184_s17   ;;  %s975_s16 = sphi %s1018_s16, %s1183_s16   ;;  %s971_s15 = sphi %s1016_s15, %s1182_s15  }
   0x4   : > { %s1041_s21 = sadd.s32 1, %s983_s18   ;;  %s72_s22 = sadd.s32 1, %s979_s17 }
   0x5   : > { %s69_s23 = ssub.s32 %s983_s18, %s1041_s21  ;;  %p82_p0 = scmp.ne.s32.totalorder %s979_s17, %s975_s16 }
   0x6   : > { %p70_p1 = scmp.eq.s32.totalorder %s69_s23, 0  ;;  %p83_p2 = scmp.eq.s32.totalorder %s1037_s19, 1 }
   0x7   : > { %p88_p3 = scmp.ne.s32.totalorder %s975_s16, %s971_s15  ;;  %p89_p4 = scmp.eq.s32.totalorder %s787_s20, 1 }
   0x8   : > { %s1052_s24 = scalar_select %p70_p1, %s979_s17, %s72_s22  }
   0x9   : > { %p1054_p5 = por %p83_p2, %p82_p0  ;;  %p1058_p6 = por %p89_p4, %p88_p3 }
   0xa   : > { %p790_p7 = scmp.ge.s32.totalorder %s983_s18, 1  ;;  %p170_p8 = scmp.lt.s32.totalorder %s983_s18, 3 }
   0xc   : > { %p171_p9 = pnand %p790_p7, %p170_p8 }
   0xd   : > { %p204_p10 = scmp.lt.s32.totalorder (!%p171_p9), %s1037_s19, 1  ;;  %v985_v0 = vmov (!%p171_p9), 0.0   ;;  %v986_v1 = vmov (!%p171_p9), 0   ;;  %vm987_vm0 = vmmov (!%p171_p9), 0   ;;  %s988_s6 = smov (!%p171_p9), 127   ;;  %vm251_vm1 = vcmask (!%p171_p9), 1039360  }
   0xe   : > { %174 = sbr.rel (%p171_p9) target bundleno = 540 (0x21c), region = 28  ;;  %828 = vmatprep.subr.bf16.mxu1 (!%p171_p9), %v985_v0  ;;  %301 = vmatprep.mubr.bf16.mxu0 (!%p171_p9), %v986_v1  ;;  %s989_s7 = smov (!%p171_p9), 126   ;;  %vm259_vm2 = vcmask (!%p171_p9), 1045504   ;;  %v795_v15 = vld [vmem:[%s1176_s1 + $0x4] sm:$0xf] (!%p171_p9)  ;;  %vm255_vm3 = vcmask (!%p171_p9), 97280   ;;  %v573_v30 = vlaneseq (!%p171_p9) }
   0xf   : > { %830 = vmatprep.mubr.msk.bf16.mxu1 (!%p171_p9), %vm987_vm0, %v985_v0  ;;  %vm458_vm4 = vcmask (!%p171_p9), 1031168   ;;  %v218_v26 = vld [vmem:[%s1176_s1] sm:$0xf] (!%p171_p9)  ;;  %v807_v29 = vld [vmem:[%s1176_s1 + $0x8] sm:$0xf] (!%p171_p9)  ;;  %s189_s14 = sand.u32 (!%p171_p9), 1, %s975_s16  }
  0x10   : > { %v574_v31 = vand.u32 (!%p171_p9), 127, %v573_v30  ;;  %s862_s20 = smul.u32 (!%p171_p9), 12, %s189_s14  ;;  %s990_s8 = smov (!%p171_p9), [#allocation2]  }
  0x11   : > { %s869_s23 = smul.u32 (!%p171_p9), 192, %s1037_s19  ;;  %s925_s9 = sshll.u32 (!%p171_p9), %s990_s8, 4  ;;  %s926_s9 = int_to_ptr.vmem [resolvable:$false] %s925_s9 }
  0x12   : > { %v576_v32 = vadd.s32 (!%p171_p9), 256, %v574_v31  ;;  %v575_v33 = vadd.s32 (!%p171_p9), 128, %v574_v31  ;;  %v1108_v34 = vmul.u32.u64.low (!%p171_p9), 2863311531, %v574_v31  ;;  %v1109_v35 = vmul.u32.u64.high 2863311531, %v574_v31, %v1108_v34  ;;  %s191_s22 = scalar_lea.vmem (!%p171_p9), [#allocation2], %s862_s20  ;;  %s927_s10 = scalar_lea.vmem (!%p171_p9), %s926_s9, 384 }
  0x14   : > { %v1111_v36 = vmul.u32.u64.low (!%p171_p9), 2863311531, %v576_v32  ;;  %v1112_v37 = vmul.u32.u64.high 2863311531, %v576_v32, %v1111_v36  ;;  %v1114_v38 = vmul.u32.u64.low (!%p171_p9), 2863311531, %v575_v33  ;;  %v1115_v39 = vmul.u32.u64.high 2863311531, %v575_v33, %v1114_v38 }
  0x15   : > { %s1066_s27 = scalar_select %p204_p10, %s1037_s19, 1  ;;  %v583_v40 = vshrl.u32 %v1109_v35, 4 }
  0x16   : > { %v605_v41 = vshrl.u32 %v1112_v37, 4  ;;  %v594_v42 = vshrl.u32 %v1115_v39, 4 }
  0x17   : > { %s819_s28 = sshll.u32 %s1066_s27, 5  ;;  %v584_v43 = vmul.u32 24, %v583_v40 }
  0x18   : > { %s208_s5 = scalar_lea.vmem %s1175_s0, %s819_s28  ;;  %v606_v44 = vmul.u32 24, %v605_v41  ;;  %v595_v45 = vmul.u32 24, %v594_v42  ;;  %s674_s28 = sshll.u32 %s191_s22, 4  ;;  %s675_s28 = int_to_ptr.vmem [resolvable:$true] %s674_s28 }
  0x19   : > { %v914_v2 = vld [vmem:[%s208_s5 + $0x8] ss:$16 sps:$4 sm:$0x3f]   ;;  %v916_v3 = vld [vmem:[%s208_s5 + $0xc] ss:$16 sps:$4 sm:$0x3f]   ;;  %v585_v46 = vsub.s32 %v574_v31, %v584_v43  ;;  %p928_p0 = scmp.lt.s32.totalorder %s675_s28, %s926_s9 }
  0x1a   : > { %247 = vrot.lane.b32.xlu1 %v914_v2, %s988_s6  ;;  %v917_v4 = vld [vmem:[%s208_s5] ss:$16 sps:$4 sm:$0x3f]   ;;  %v919_v5 = vld [vmem:[%s208_s5 + $0x4] ss:$16 sps:$4 sm:$0x3f]   ;;  %v607_v47 = vsub.s32 %v576_v32, %v606_v44  ;;  %v596_v48 = vsub.s32 %v575_v33, %v595_v45 }
  0x1b   : > { %243 = vrot.lane.b32.xlu0 %v917_v4, %s988_s6  ;;  %v920_v9 = vld [vmem:[%s208_s5 + $0x8] ss:$16 sps:$4 sm:$0x3f]   ;;  %v359_v19 = vsel %vm259_vm2, %v917_v4, 0  ;;  %vm610_vm5 = vcmp.ne.s32.totalorder %v585_v46, 0  ;;  %vm613_vm6 = vcmp.lt.s32.totalorder %v585_v46, 0  ;;  %s1130_s5 = scalar_lea.hbm %s1177_s2, %s869_s23 }
  0x1c   : > { %v365_v17 = vsel %vm259_vm2, %v920_v9, 0  ;;  %vm612_vm7 = vcmp.ne.s32.totalorder %v607_v47, 0  ;;  %vm615_vm8 = vcmp.lt.s32.totalorder %v607_v47, 0  ;;  %vm611_vm9 = vcmp.ne.s32.totalorder %v596_v48, 0  ;;  %vm616_vm11 = vmand %vm613_vm6, %vm610_vm5 }
  0x1d   : > { %vm614_vm10 = vcmp.lt.s32.totalorder %v596_v48, 0  ;;  %v619_v49 = vadd.s32 24, %v585_v46  ;;  %vm618_vm12 = vmand %vm615_vm8, %vm612_vm7  ;;  %v621_v50 = vadd.s32 24, %v607_v47  ;;  %v620_v51 = vadd.s32 24, %v596_v48 }
  0x1e   : > { %249 = vrot.lane.b32.xlu1 %v916_v3, %s988_s6  ;;  %vm617_vm13 = vmand %vm614_vm10, %vm611_vm9 }
  0x1f   : > { %245 = vrot.lane.b32.xlu0 %v919_v5, %s988_s6  ;;  %v622_v52 = vsel %vm616_vm11, %v619_v49, %v585_v46  ;;  %v624_v53 = vsel %vm618_vm12, %v621_v50, %v607_v47  ;;  %v623_v54 = vsel %vm617_vm13, %v620_v51, %v596_v48  ;;  %s652_s6 = scalar_lea.sflag [#allocation3], %s189_s14 }
  0x20   : > { %vm625_vm14 = vcmp.lt.s32.totalorder %v622_v52, 16  ;;  %vm627_vm15 = vcmp.lt.s32.totalorder %v624_v53, 16 }
  0x21   : > { %v813_v55 = vsel %vm625_vm14, 1.0, %v985_v0  ;;  %v815_v58 = vsel %vm627_vm15, 1.0, %v985_v0 }
  0x22   : > { %452 = vrot.lane.b32.xlu1 %v919_v5, %s989_s7 }
  0x23   : > { %450 = vrot.lane.b32.xlu0 %v917_v4, %s989_s7 }
  0x26   : > { %456 = vrot.lane.b32.xlu1 %v916_v3, %s989_s7 }
  0x27   : > { %454 = vrot.lane.b32.xlu0 %v914_v2, %s989_s7  ;;  %s921_s7 = scalar_lea.vmem %s675_s28, 192 }
  0x28   : > { %p922_p11 = scmp.ne.s32.totalorder %s675_s28, %s921_s7  ;;  %p929_p1 = scmp.lt.s32.totalorder %s927_s10, %s921_s7 }
  0x2a   : > { %p923_p12 = pnand %p922_p11, %p1054_p5  ;;  %p930_p2 = por %p929_p1, %p928_p0 }
  0x2c   : > { %p924_p13 = pneg %p923_p12 }
  0x2e   : > { %p931_p3 = pnand %p930_p2, %p924_p13 }
  0x8c   : > { %v248_v6 = vpop.permute.xlu1 %247 }
  0x8d   : > { %v244_v7 = vpop.permute.xlu0 %243 }
  0x90   : > { %v250_v8 = vpop.permute.xlu1 %249 }
  0x91   : > { %v254_v10 = vsel %vm251_vm1, %v248_v6, %v250_v8  ;;  %v246_v11 = vpop.permute.xlu0 %245 }
  0x92   : > { %v267_v12 = vsel %vm259_vm2, %v254_v10, 0  ;;  %v253_v13 = vsel %vm251_vm1, %v246_v11, %v248_v6  ;;  %v252_v14 = vsel %vm251_vm1, %v244_v7, %v246_v11 }
  0x93   : > { %829 = vmatpush3.bf16.msra.mxu1 %v267_v12  ;;  %800 = vmatprep.subr.msk.bf16.mxu0 %vm259_vm2, %v253_v13  ;;  %v261_v16 = vsel %vm259_vm2, %v252_v14, 0 }
  0x94   : > { %834 = vmatprep.subr.bf16.mxu1 %v985_v0  ;;  %v453_v18 = vpop.permute.xlu1 %452  ;;  %270 = vmatpush1.bf16.msra.mxu0 %v261_v16 }
  0x95   : > { %804 = vmatprep.subr.msk.bf16.mxu0 %vm259_vm2, %v919_v5  ;;  %v451_v20 = vpop.permute.xlu0 %450 }
  0x96   : > { %831 = vmatmul.mubr.msk.bf16.vlgmr.msra.gmra.mrb[0].mxu1 %vm255_vm3, %v795_v15  ;;  %v459_v25 = vsel %vm458_vm4, %v451_v20, %v453_v18 }
  0x97   : > { %835 = vmatpush3.bf16.msra.mxu1 %v365_v17  ;;  %836 = vmatprep.mubr.msk.bf16.mxu1 %vm987_vm0, %v985_v0  ;;  %v466_v28 = vsel %vm259_vm2, %v459_v25, 0 }
  0x98   : > { %801 = vmatmul.mubr.msk.bf16.vlgmr.msra.gmra.mrb[0].mxu0 %vm255_vm3, %v795_v15  ;;  %840 = vmatprep.subr.bf16.mxu1 %v985_v0  ;;  %v457_v22 = vpop.permute.xlu1 %456 }
  0x99   : > { %368 = vmatpush1.bf16.msra.mxu0 %v359_v19  ;;  %399 = vmatprep.mubr.bf16.mxu0 %v986_v1  ;;  %v455_v21 = vpop.permute.xlu0 %454 }
  0x9a   : > { %v460_v23 = vsel %vm458_vm4, %v453_v18, %v455_v21  ;;  %v461_v24 = vsel %vm458_vm4, %v455_v21, %v457_v22 }
  0x9b   : > { %808 = vmatprep.subr.msk.bf16.mxu0 %vm259_vm2, %v460_v23  ;;  %v472_v27 = vsel %vm259_vm2, %v461_v24, 0 }
  0xa2   : > { %837 = vmatmul.mubr.msk.bf16.vlgmr.msra.gmra.mrb[0].mxu1 %vm255_vm3, %v218_v26 }
  0xa3   : > { %841 = vmatpush3.bf16.msra.mxu1 %v472_v27  ;;  %842 = vmatprep.mubr.msk.bf16.mxu1 %vm987_vm0, %v985_v0  ;;  %vm626_vm0 = vcmp.lt.s32.totalorder %v623_v54, 16 }
  0xa4   : > { %805 = vmatmul.mubr.msk.bf16.vlgmr.msra.gmra.mrb[0].mxu0 %vm255_vm3, %v218_v26  ;;  %v814_v59 = vsel %vm626_vm0, 1.0, %v985_v0 }
  0xa5   : > { %475 = vmatpush1.bf16.msra.mxu0 %v466_v28  ;;  %506 = vmatprep.mubr.bf16.mxu0 %v986_v1 }
  0xae   : > { %843 = vmatmul.mubr.msk.bf16.vlgmr.msra.gmra.mrb[0].mxu1 %vm255_vm3, %v807_v29 }
  0xb0   : > { %809 = vmatmul.mubr.msk.bf16.vlgmr.msra.gmra.mrb[0].mxu0 %vm255_vm3, %v807_v29 }
 0x181   : > { %v549_v56 = vpop.f32.mrb[0].mxu1 }
 0x182   : > { %v821_v57 = vpack.c.bf16 %v549_v56, %v549_v56  ;;  %v844_v60 = vpop.f32.mrb[1].mxu1  ;;  %v636_v3 = vmul.f32 %v815_v58, %v549_v56 }
 0x183   : > { %v508_v61 = vpop.f32.mrb[0].mxu0  ;;  %v552_v62 = vpop.f32.mrb[2].mxu1 }
 0x184   : > { %v634_v63 = vmul.f32 %v813_v55, %v508_v61  ;;  %572 = vst [vmem:[%s191_s22 + $0x8] sm:$0xf] %v821_v57  ;;  %v510_v1 = vpop.f32.mrb[1].mxu0  ;;  %v845_v2 = vpop.f32.mrb[3].mxu1  ;;  %v645_v11 = vmul.f32 %v636_v3, %v636_v3 }
 0x185   : > { %v820_v4 = vpack.c.bf16 %v510_v1, %v508_v61  ;;  %v635_v5 = vmul.f32 %v814_v59, %v510_v1  ;;  %v512_v6 = vpop.f32.mrb[2].mxu0 }
 0x186   : > { %v643_v7 = vmul.f32 %v634_v63, %v634_v63  ;;  %v513_v8 = vpop.f32.mrb[3].mxu0 }
 0x187   : > { %571 = vst [vmem:[%s191_s22] sm:$0xff] %v820_v4  ;;  %v644_v9 = vmul.f32 %v635_v5, %v635_v5  ;;  %v637_v0 = vadd.f32 %v635_v5, %v634_v63 }
 0x189   : > { %v638_v10 = vadd.f32 %v637_v0, %v636_v3  ;;  %v646_v12 = vadd.f32 %v644_v9, %v643_v7 }
 0x18b   : > { %639 = vadd.xlane.f32.xlu0 %v638_v10  ;;  %v647_v13 = vadd.f32 %v646_v12, %v645_v11 }
 0x18d   : > { %648 = vadd.xlane.f32.xlu1 %v647_v13 }
 0x18e   : > { %934 = shalt.err (!%p931_p3)
}
 0x18f   : > { %s935_s19 = scalar_lea.hbm %s1130_s5, 192  ;;  %s939_s13 = scalar_lea.hbm %s1177_s2, 384 }
 0x190   : > { %p936_p4 = scmp.ne.s32.totalorder %s1130_s5, %s935_s19  ;;  %p940_p9 = scmp.lt.u32.totalorder %s1130_s5, %s1177_s2 }
 0x191   : > { %p941_p10 = scmp.lt.u32.totalorder %s939_s13, %s935_s19  ;;  %p943_p12 = scmp.lt.u32.totalorder %s935_s19, %s1130_s5 }
 0x192   : > { %p937_p7 = pnand %p936_p4, %p1054_p5 }
 0x193   : > { %p942_p11 = por %p941_p10, %p940_p9 }
 0x194   : > { %p938_p8 = pneg %p937_p7 }
 0x195   : > { %p944_p13 = por %p943_p12, %p942_p11 }
 0x197   : > { %p945_p0 = pnand %p944_p13, %p938_p8 }
 0x199   : > { %948 = shalt.err (!%p945_p0)
}
 0x19a   : > { %870 = dma.vmem_to_hbm [thread:$0]  (%p1054_p5), %s675_s28, 192, %s1130_s5, %s652_s6   ;;  %vm641_vm1 = vcmask 7168  }
 0x19b   : > { %s793_s22 = sshll.u32 %s1066_s27, 3 }
 0x19c   : > { %s212_s30 = scalar_lea.vmem %s1178_s3, %s793_s22  ;;  %s216_s9 = scalar_lea.vmem %s1179_s4, %s793_s22 }
 0x218   : > { %v640_v14 = vpop.xlane.xlu0 %639 }
 0x219   : > { %642 = vst.msk [vmem:[%s212_s30] sm:$0xff] %vm641_vm1, %v640_v14 }
 0x21a   : > { %v649_v15 = vpop.xlane.xlu1 %648 }
 0x21b   : > { %650 = vst.msk [vmem:[%s216_s9] sm:$0xff] %vm641_vm1, %v649_v15 }
 0x21c PF: > { %p876_p1 = scmp.ge.s32.totalorder %s983_s18, 2  ;;  %s692_s25 = sand.u32 1, %s971_s15  }
 0x21d   : > { %s693_s27 = scalar_lea.sflag [#allocation3], %s692_s25 }
 0x21e   : > { %p873_p5 = pnand %p876_p1, %p1058_p6 }
 0x220   : > { %966 = dma.done.wait (!%p873_p5), %s693_s27, 192  }
 0x221   : > { %968 = vsyncadd (!%p873_p5), %s693_s27, 4294967104  ;;  %p15_p2 = scmp.ge.s32.totalorder %s1041_s21, 4   ;;  %s1182_s15 = smov %s975_s16 }
 0x222   : > { %s1183_s16 = smov %s979_s17  ;;  %s1184_s17 = smov %s1052_s24 }
 0x223   : > { %s1185_s18 = smov %s1041_s21  ;;  %17 = sbr.rel (!%p15_p2) target bundleno = 3 (0x3), region = 89 }
 0x22a   :  { %712 = vsyncpa [#allocation3], 1 }
 0x22b   :  { %714 = vsyncpa [#allocation3 + $0x1], 1 }

</bundles_post_ra>
